<compile_context>
chip_gen: v5e
topology: v5e:2x2
jax: 0.10.0
libtpu: 0.0.40
codegen_flags: <defaults>
</compile_context>

<pallas_src>
import jax
import jax.numpy as jnp
from jax.experimental import pallas as pl
from jax.experimental.pallas import tpu as pltpu

HIDDEN_SIZE = 10
_SUBLANE = 8


def _round_up(n, m):
    return (n + m - 1) // m * m


def rnn_fused_kernel(onehot_ref, w_ref, out_ref):
    """Fused (embedding + input projection) matmul + unrolled tanh recurrence.

    onehot_ref: (T*B, Vp) f32  time-major one-hot token rows (row r = t*B + b)
    w_ref:      (Vp+H, H) f32  rows [0:Vp] = M = E @ W_ih^T (zero-padded rows >= V)
                               rows [Vp:]  = W_hh^T
    out_ref:    (B, H)    f32  final hidden state h_T
    """
    TB = onehot_ref.shape[0]
    B, H = out_ref.shape
    T = TB // B
    Vp = w_ref.shape[0] - H

    w = w_ref[...]
    m = w[:Vp, :]          # (Vp, H)  fused embedding+input-projection table
    whh_t = w[Vp:, :]      # (H, H)   W_hh^T

    # Embedding gather + input projection collapsed into ONE matmul for all
    # timesteps:  (onehot @ E) @ W_ih^T == onehot @ (E @ W_ih^T) == onehot @ M.
    xproj = jnp.dot(onehot_ref[...], m,
                    preferred_element_type=jnp.float32)          # (T*B, H)

    # Fully-unrolled tanh recurrence (T is static) -- the only serial chain.
    # TODO(synk): could keep W_hh^T resident in the MXU across steps via
    # pltpu.matmul_push_rhs / matmul_acc_lhs / matmul_pop; kept as jnp.dot for
    # portability/robustness at these tiny (B,H) shapes.
    h = jnp.zeros((B, H), dtype=jnp.float32)
    for t in range(T):
        x_t = xproj[t * B:(t + 1) * B, :]                        # static slice (B, H)
        h = jnp.tanh(x_t + jnp.dot(h, whh_t,
                                   preferred_element_type=jnp.float32))
    out_ref[...] = h


def pack_params(embedding, w_ih, w_hh):
    """Precompute the fused, padded weight slab once per parameter set.

    Returns (w_packed, v_pad) with
      w_packed: (Vp + H, H) f32; rows [0:Vp] = E @ W_ih^T (zero-padded),
                rows [Vp:] = W_hh^T.
    """
    V, _ = embedding.shape
    H = w_hh.shape[0]
    v_pad = _round_up(V, _SUBLANE)
    m = jnp.dot(embedding.astype(jnp.float32),
                jnp.transpose(w_ih).astype(jnp.float32))          # (V, H)
    m_pad = jnp.zeros((v_pad, H), jnp.float32).at[:V, :].set(m)
    w_packed = jnp.concatenate(
        [m_pad, jnp.transpose(w_hh).astype(jnp.float32)], axis=0)
    return w_packed, v_pad


def rnn_final_state(x_ids, w_packed, v_pad):
    """x_ids: (B, T) int32; w_packed: (Vp+H, H) f32 -> final hidden state (B, H)."""
    B, T = x_ids.shape
    H = w_packed.shape[1]

    # Time-major ids -> lane-dense f32 one-hot (~1.5 KB).  Out-of-range ids give
    # an all-zero row (zero embedding) -- same semantics as the one-hot gather.
    ids_tm = jnp.transpose(x_ids).reshape(T * B)
    onehot = jax.nn.one_hot(ids_tm, v_pad, dtype=jnp.float32)     # (T*B, Vp)

    return pl.pallas_call(
        rnn_fused_kernel,
        out_shape=jax.ShapeDtypeStruct((B, H), jnp.float32),
        in_specs=[
            pl.BlockSpec(memory_space=pltpu.MemorySpace.VMEM),
            pl.BlockSpec(memory_space=pltpu.MemorySpace.VMEM),
        ],
        out_specs=pl.BlockSpec(memory_space=pltpu.MemorySpace.VMEM),
    )(onehot, w_packed)


class NlpSimpleModuleJax:
    """JAX/Pallas port of NlpSimpleModule (deterministic synthetic params)."""

    def __init__(self, letter_dim, vocab_size, key):
        k_emb, k_ih, k_hh = jax.random.split(key, 3)
        # nn.Embedding default init: N(0, 1)
        self.embedding = jax.random.normal(
            k_emb, (vocab_size, letter_dim), dtype=jnp.float32)
        # nn.RNN default init: U(-1/sqrt(H), 1/sqrt(H)), no bias
        bound = 1.0 / jnp.sqrt(jnp.float32(HIDDEN_SIZE))
        self.w_ih = jax.random.uniform(
            k_ih, (HIDDEN_SIZE, letter_dim), jnp.float32, -bound, bound)
        self.w_hh = jax.random.uniform(
            k_hh, (HIDDEN_SIZE, HIDDEN_SIZE), jnp.float32, -bound, bound)
        # Fused + padded weight slab built once (not per forward call).
        self.w_packed, self.v_pad = pack_params(
            self.embedding, self.w_ih, self.w_hh)

    def __call__(self, x, y=None):
        # x: (B, T) int32 token ids; gather + projection + recurrence fused in
        # the single Pallas kernel.
        h_n = rnn_final_state(x, self.w_packed, self.v_pad)       # (B, H)
        y_pred = jnp.squeeze(h_n)  # matches x2.squeeze() in the PyTorch module
        if y is not None:
            # cross-entropy with integer targets (mean reduction), plain-JAX glue
            logits = y_pred if y_pred.ndim == 2 else y_pred[None, :]
            tgt = y if y.ndim >= 1 else y[None]
            logz = jax.nn.logsumexp(logits, axis=-1)
            nll = logz - jnp.take_along_axis(logits, tgt[:, None], axis=-1)[:, 0]
            return jnp.mean(nll)
        return y_pred


def reference_forward(module, x):
    """Pure-JAX reference for correctness check."""
    emb = jnp.take(module.embedding, x, axis=0)  # (B, T, D)
    B, T, _ = emb.shape
    h = jnp.zeros((B, HIDDEN_SIZE), jnp.float32)
    for t in range(T):
        h = jnp.tanh(emb[:, t, :] @ module.w_ih.T + h @ module.w_hh.T)
    return h


if __name__ == "__main__":
    key = jax.random.PRNGKey(0)
    k_param, k_x = jax.random.split(key)

    vocab_size = 20
    letter_dim = 16
    batch = 2
    seq = 8

    module = NlpSimpleModuleJax(letter_dim, vocab_size, k_param)
    x = jax.random.randint(k_x, (batch, seq), 0, vocab_size, dtype=jnp.int32)

    y_pred = module(x)
    y_pred = jax.block_until_ready(y_pred)

    ref = reference_forward(module, x)
    assert y_pred.shape == (batch, HIDDEN_SIZE)
    assert jnp.allclose(y_pred, ref, atol=1e-4, rtol=1e-4)

    print("KERNEL_OK")
</pallas_src>

<mosaic_0001>
module attributes {stable_mosaic.version = 11 : i64} {
  func.func @rnn_fused_kernel(%arg0: memref<16x24xf32, #tpu.memory_space<vmem>>, %arg1: memref<34x10xf32, #tpu.memory_space<vmem>>, %arg2: memref<2x10xf32, #tpu.memory_space<vmem>>) attributes {dimension_semantics = [], scalar_prefetch = 0 : i64, scratch_operands = 0 : i64, tpu.core_type = #tpu.core_type<tc>} {
    %c0 = arith.constant 0 : index
    %c0_0 = arith.constant 0 : index
    %0 = vector.load %arg1[%c0, %c0_0] : memref<34x10xf32, #tpu.memory_space<vmem>>, vector<34x10xf32>
    %1 = vector.extract_strided_slice %0 {offsets = [0, 0], sizes = [24, 10], strides = [1, 1]} : vector<34x10xf32> to vector<24x10xf32>
    %2 = vector.extract_strided_slice %0 {offsets = [24, 0], sizes = [10, 10], strides = [1, 1]} : vector<34x10xf32> to vector<10x10xf32>
    %c0_1 = arith.constant 0 : index
    %c0_2 = arith.constant 0 : index
    %3 = vector.load %arg0[%c0_1, %c0_2] : memref<16x24xf32, #tpu.memory_space<vmem>>, vector<16x24xf32>
    %cst = arith.constant dense<0.000000e+00> : vector<16x10xf32>
    %4 = tpu.matmul %3, %1, %cst {dimension_numbers = #tpu.dot_dimension_numbers<[1], [0], [0], [1], [0, 0, 1, 1], [], []>} : vector<16x24xf32>, vector<24x10xf32>, vector<16x10xf32> -> vector<16x10xf32>
    %cst_3 = arith.constant 0.000000e+00 : f32
    %5 = vector.broadcast %cst_3 : f32 to vector<2x10xf32>
    %6 = vector.extract_strided_slice %4 {offsets = [0, 0], sizes = [2, 10], strides = [1, 1]} : vector<16x10xf32> to vector<2x10xf32>
    %cst_4 = arith.constant dense<0.000000e+00> : vector<2x10xf32>
    %7 = tpu.matmul %5, %2, %cst_4 {dimension_numbers = #tpu.dot_dimension_numbers<[1], [0], [0], [1], [0, 0, 1, 1], [], []>} : vector<2x10xf32>, vector<10x10xf32>, vector<2x10xf32> -> vector<2x10xf32>
    %8 = arith.addf %6, %7 : vector<2x10xf32>
    %9 = math.tanh %8 : vector<2x10xf32>
    %10 = vector.extract_strided_slice %4 {offsets = [2, 0], sizes = [2, 10], strides = [1, 1]} : vector<16x10xf32> to vector<2x10xf32>
    %cst_5 = arith.constant dense<0.000000e+00> : vector<2x10xf32>
    %11 = tpu.matmul %9, %2, %cst_5 {dimension_numbers = #tpu.dot_dimension_numbers<[1], [0], [0], [1], [0, 0, 1, 1], [], []>} : vector<2x10xf32>, vector<10x10xf32>, vector<2x10xf32> -> vector<2x10xf32>
    %12 = arith.addf %10, %11 : vector<2x10xf32>
    %13 = math.tanh %12 : vector<2x10xf32>
    %14 = vector.extract_strided_slice %4 {offsets = [4, 0], sizes = [2, 10], strides = [1, 1]} : vector<16x10xf32> to vector<2x10xf32>
    %cst_6 = arith.constant dense<0.000000e+00> : vector<2x10xf32>
    %15 = tpu.matmul %13, %2, %cst_6 {dimension_numbers = #tpu.dot_dimension_numbers<[1], [0], [0], [1], [0, 0, 1, 1], [], []>} : vector<2x10xf32>, vector<10x10xf32>, vector<2x10xf32> -> vector<2x10xf32>
    %16 = arith.addf %14, %15 : vector<2x10xf32>
    %17 = math.tanh %16 : vector<2x10xf32>
    %18 = vector.extract_strided_slice %4 {offsets = [6, 0], sizes = [2, 10], strides = [1, 1]} : vector<16x10xf32> to vector<2x10xf32>
    %cst_7 = arith.constant dense<0.000000e+00> : vector<2x10xf32>
    %19 = tpu.matmul %17, %2, %cst_7 {dimension_numbers = #tpu.dot_dimension_numbers<[1], [0], [0], [1], [0, 0, 1, 1], [], []>} : vector<2x10xf32>, vector<10x10xf32>, vector<2x10xf32> -> vector<2x10xf32>
    %20 = arith.addf %18, %19 : vector<2x10xf32>
    %21 = math.tanh %20 : vector<2x10xf32>
    %22 = vector.extract_strided_slice %4 {offsets = [8, 0], sizes = [2, 10], strides = [1, 1]} : vector<16x10xf32> to vector<2x10xf32>
    %cst_8 = arith.constant dense<0.000000e+00> : vector<2x10xf32>
    %23 = tpu.matmul %21, %2, %cst_8 {dimension_numbers = #tpu.dot_dimension_numbers<[1], [0], [0], [1], [0, 0, 1, 1], [], []>} : vector<2x10xf32>, vector<10x10xf32>, vector<2x10xf32> -> vector<2x10xf32>
    %24 = arith.addf %22, %23 : vector<2x10xf32>
    %25 = math.tanh %24 : vector<2x10xf32>
    %26 = vector.extract_strided_slice %4 {offsets = [10, 0], sizes = [2, 10], strides = [1, 1]} : vector<16x10xf32> to vector<2x10xf32>
    %cst_9 = arith.constant dense<0.000000e+00> : vector<2x10xf32>
    %27 = tpu.matmul %25, %2, %cst_9 {dimension_numbers = #tpu.dot_dimension_numbers<[1], [0], [0], [1], [0, 0, 1, 1], [], []>} : vector<2x10xf32>, vector<10x10xf32>, vector<2x10xf32> -> vector<2x10xf32>
    %28 = arith.addf %26, %27 : vector<2x10xf32>
    %29 = math.tanh %28 : vector<2x10xf32>
    %30 = vector.extract_strided_slice %4 {offsets = [12, 0], sizes = [2, 10], strides = [1, 1]} : vector<16x10xf32> to vector<2x10xf32>
    %cst_10 = arith.constant dense<0.000000e+00> : vector<2x10xf32>
    %31 = tpu.matmul %29, %2, %cst_10 {dimension_numbers = #tpu.dot_dimension_numbers<[1], [0], [0], [1], [0, 0, 1, 1], [], []>} : vector<2x10xf32>, vector<10x10xf32>, vector<2x10xf32> -> vector<2x10xf32>
    %32 = arith.addf %30, %31 : vector<2x10xf32>
    %33 = math.tanh %32 : vector<2x10xf32>
    %34 = vector.extract_strided_slice %4 {offsets = [14, 0], sizes = [2, 10], strides = [1, 1]} : vector<16x10xf32> to vector<2x10xf32>
    %cst_11 = arith.constant dense<0.000000e+00> : vector<2x10xf32>
    %35 = tpu.matmul %33, %2, %cst_11 {dimension_numbers = #tpu.dot_dimension_numbers<[1], [0], [0], [1], [0, 0, 1, 1], [], []>} : vector<2x10xf32>, vector<10x10xf32>, vector<2x10xf32> -> vector<2x10xf32>
    %36 = arith.addf %34, %35 : vector<2x10xf32>
    %37 = math.tanh %36 : vector<2x10xf32>
    %c0_12 = arith.constant 0 : index
    %c0_13 = arith.constant 0 : index
    %38 = vector.load %arg2[%c0_12, %c0_13] : memref<2x10xf32, #tpu.memory_space<vmem>>, vector<2x10xf32>
    tpu.vector_store %arg2[%c0_12, %c0_13], %37 {strides = array<i32>} : memref<2x10xf32, #tpu.memory_space<vmem>>, vector<2x10xf32>,
    return
  }
}

</mosaic_0001>

<bundles_post_ra>
// kernel: tpu_custom_call.1
= control target key start
LH: loop header
LB: loop body
LE: loop exit
PB: predicated region body
PF: predicated region fallthrough
CT: control target
= control target key end

     0   :  { %vm53_vm0 = vcmask 1041408   ;;  %s414_s0 = inlined_call_operand.vmem [shape: f32[16,24], index: 0, kind: input, shape index: {}]   ;;  %s415_s1 = inlined_call_operand.vmem [shape: f32[34,10], index: 1, kind: input, shape index: {}]   ;;  %s416_s2 = inlined_call_operand.hbm [shape: f32[2,10], index: 2, kind: output, shape index: {}]  }
   0x1   :  { %v14_v0 = vld [vmem:[%s415_s1 + $0x10] sm:$0xff]  ;;  %v13_v1 = vld [vmem:[%s415_s1 + $0x8] sm:$0xff]  ;;  %v16_v2 = vld [vmem:[%s415_s1 + $0x20] sm:$0x3] }
   0x2   :  { %39 = vmatpush.msra.mxu0 %v14_v0  ;;  %297 = vmatpush.msk.msra.mxu1 %vm53_vm0, %v16_v2  ;;  %v15_v3 = vld [vmem:[%s415_s1 + $0x18] sm:$0xff]  ;;  %v12_v4 = vld [vmem:[%s415_s1] sm:$0xff] }
   0x3   :  { %298 = vmatpush.msk.msra.mxu2 %vm53_vm0, %v16_v2  ;;  %300 = vmatpush.msk.msra.mxu3 %vm53_vm0, %v16_v2 }
   0x4   :  { %7 = vsyncpa [#allocation3], 0  ;;  %40 = vmatpush.msra.mxu0 %v13_v1  ;;  %72 = vmatpush.msra.mxu1 %v15_v3  ;;  %v17_v5 = vld [vmem:[%s414_s0] sm:$0xff]  ;;  %vm19_vm1 = vcmask 195584   ;;  %v356_v6 = vmov 0.0   ;;  %vm49_vm2 = vcmask 80896  }
   0x5   :  { %73 = vmatmul.f32.vlgmr.msra.gmra.mxu1 %v356_v6  ;;  %97 = vmatpush.msra.mxu2 %v15_v3  ;;  %v18_v21 = vld [vmem:[%s414_s0 + $0x8] sm:$0xff]  ;;  %s357_s0 = smov [#allocation2]   ;;  %s286_s25 = sshll.u32 %s416_s2, 4  ;;  %vm277_vm3 = vcmask 80902   ;;  %s287_s25 = int_to_ptr.hbm [resolvable:$true] %s286_s25 }
   0x6   :  { %41 = vmatpush.msra.mxu0 %v12_v4  ;;  %126 = vmatpush.msra.mxu3 %v15_v3  ;;  %s284_s22 = sshll.u32 %s357_s0, 4  ;;  %s285_s22 = int_to_ptr.vmem [resolvable:$true] %s284_s22 }
   0x7   :  { %295 = vmatmul.msk.f32.vlgmr.msra.gmra.mxu0 %vm19_vm1, %v17_v5  ;;  %302 = vmatpush.msk.msrb.mxu1 %vm53_vm0, %v16_v2 }
   0x8   :  { %304 = vmatpush.msk.msrb.mxu2 %vm53_vm0, %v16_v2  ;;  %306 = vmatpush.msk.msrb.mxu3 %vm53_vm0, %v16_v2 }
   0x9   :  { %155 = vmatpush.msrb.mxu1 %v15_v3 }
   0xa   :  { %184 = vmatpush.msrb.mxu2 %v15_v3  ;;  %209 = vmatpush.msrb.mxu3 %v15_v3 }
   0xb   :  { %308 = vmatpush.msk.msra.mxu1 %vm53_vm0, %v16_v2 }
   0xd   :  { %238 = vmatpush.msra.mxu1 %v15_v3 }
   0xf   :  { %296 = vmatmul.msk.f32.gmra.mxu0 %vm19_vm1, %v18_v21 }
  0x82   :  { %v74_v7 = vpop.f32.mrf.mxu1 }
  0x84   :  { %v43_v8 = vpop.f32.mrf.mxu0 }
  0x85   :  { %v77_v9 = vadd.f32 %v74_v7, %v43_v8 }
  0x87   :  { %314 = vtanh.f32 %v77_v9 }
  0x8c   :  { %v46_v27 = vpop.f32.mrf.mxu0 }
  0x8d   :  { %v315_v10 = vpop.eup %314 }
  0x8e   :  { %299 = vmatmul.msk.f32.vlgmr.msra.gmra.mxu2 %vm49_vm2, %v315_v10 }
  0x8f   :  { %310 = vmatpush.msk.msra.mxu2 %vm53_vm0, %v16_v2 }
  0x91   :  { %267 = vmatpush.msra.mxu2 %v15_v3 }
 0x111   :  { %v99_v11 = vpop.f32.mrf.mxu2 }
 0x112   :  { %v103_v12 = vrot.slane %v99_v11, 6 }
 0x114   :  { %v105_v13 = vadd.f32 %v103_v12, %v43_v8 }
 0x116   :  { %316 = vtanh.f32 %v105_v13 }
 0x11c   :  { %v317_v14 = vpop.eup %316 }
 0x11d   :  { %v108_v15 = vrot.slane %v317_v14, 2 }
 0x11f   :  { %301 = vmatmul.msk.f32.vlgmr.msra.gmra.mxu3 %vm49_vm2, %v108_v15 }
 0x1a2   :  { %v128_v16 = vpop.f32.mrf.mxu3 }
 0x1a3   :  { %v132_v17 = vrot.slane %v128_v16, 4 }
 0x1a5   :  { %v134_v18 = vadd.f32 %v132_v17, %v43_v8 }
 0x1a7   :  { %318 = vtanh.f32 %v134_v18 }
 0x1ad   :  { %v319_v19 = vpop.eup %318 }
 0x1ae   :  { %v137_v20 = vrot.slane %v319_v19, 4 }
 0x1b0   :  { %303 = vmatmul.msk.f32.vlgmr.msrb.gmra.mxu1 %vm49_vm2, %v137_v20 }
 0x22d   :  { %v157_v22 = vpop.f32.mrf.mxu1 }
 0x22e   :  { %v161_v23 = vrot.slane %v157_v22, 2 }
 0x230   :  { %v163_v24 = vadd.f32 %v161_v23, %v43_v8 }
 0x232   :  { %320 = vtanh.f32 %v163_v24 }
 0x238   :  { %v321_v25 = vpop.eup %320 }
 0x239   :  { %v166_v26 = vrot.slane %v321_v25, 6 }
 0x23b   :  { %305 = vmatmul.msk.f32.vlgmr.msrb.gmra.mxu2 %vm49_vm2, %v166_v26 }
 0x2be   :  { %v186_v28 = vpop.f32.mrf.mxu2 }
 0x2bf   :  { %v189_v29 = vadd.f32 %v186_v28, %v46_v27 }
 0x2c1   :  { %322 = vtanh.f32 %v189_v29 }
 0x2c7   :  { %v323_v30 = vpop.eup %322 }
 0x2c8   :  { %307 = vmatmul.msk.f32.vlgmr.msrb.gmra.mxu3 %vm49_vm2, %v323_v30 }
 0x34b   :  { %v211_v31 = vpop.f32.mrf.mxu3 }
 0x34c   :  { %v215_v32 = vrot.slane %v211_v31, 6 }
 0x34e   :  { %v217_v33 = vadd.f32 %v215_v32, %v46_v27 }
 0x350   :  { %324 = vtanh.f32 %v217_v33 }
 0x356   :  { %v325_v34 = vpop.eup %324 }
 0x357   :  { %v220_v35 = vrot.slane %v325_v34, 2 }
 0x359   :  { %309 = vmatmul.msk.f32.vlgmr.msra.gmra.mxu1 %vm49_vm2, %v220_v35 }
 0x3d6   :  { %v240_v36 = vpop.f32.mrf.mxu1 }
 0x3d7   :  { %v244_v37 = vrot.slane %v240_v36, 4 }
 0x3d9   :  { %v246_v38 = vadd.f32 %v244_v37, %v46_v27 }
 0x3db   :  { %326 = vtanh.f32 %v246_v38 }
 0x3e1   :  { %v327_v39 = vpop.eup %326 }
 0x3e2   :  { %v249_v40 = vrot.slane %v327_v39, 4 }
 0x3e4   :  { %311 = vmatmul.msk.f32.vlgmr.msra.gmra.mxu2 %vm49_vm2, %v249_v40 }
 0x467   :  { %v269_v41 = vpop.f32.mrf.mxu2 }
 0x468   :  { %v273_v42 = vrot.slane %v269_v41, 2 }
 0x46a   :  { %v275_v43 = vadd.f32 %v273_v42, %v46_v27 }
 0x46c   :  { %328 = vtanh.f32 %v275_v43 }
 0x472   :  { %v329_v44 = vpop.eup %328 }
 0x473   :  { %278 = vst.msk [vmem:[#allocation2 - $0x6] sm:$0xc0] %vm277_vm3, %v329_v44 }
 0x474   :  { %289 = dma.vmem_to_hbm [thread:$0]  %s285_s22, 32, %s287_s25, [#allocation3]  }
 0x475   :  { %354 = dma.done.wait [#allocation3], 32  }
 0x476   :  { %355 = vsyncadd [#allocation3], 4294967264 }
 0x477   :  { %294 = vsyncpa [#allocation3], 1 }

</bundles_post_ra>
